<compile_context>
chip_gen: v6e
topology: v6e:2x2x1
jax: 0.10.0
libtpu: 0.0.40
codegen_flags: <defaults>
</compile_context>

<pallas_src>
import functools
import math

import jax
import jax.numpy as jnp
from jax.experimental import pallas as pl
from jax.experimental.pallas import tpu as pltpu


def _round_up(x, m):
    return ((x + m - 1) // m) * m


def make_fixed_positional_encoding(d_model, max_len=1024, scale_factor=1.0,
                                   dtype=jnp.float32):
    """Build the PE buffer exactly like the PyTorch __init__ (shape [max_len, d_model])."""
    position = jnp.arange(0, max_len, dtype=jnp.float32)[:, None]            # [max_len, 1]
    div_term = jnp.exp(jnp.arange(0, d_model, 2, dtype=jnp.float32)
                       * (-math.log(10000.0) / d_model))                     # [ceil(d/2)]
    pe = jnp.zeros((max_len, d_model), dtype=jnp.float32)
    pe = pe.at[:, 0::2].set(jnp.sin(position * div_term))
    n_cos = d_model // 2                                   # guard for odd d_model
    pe = pe.at[:, 1::2].set(jnp.cos(position * div_term[:n_cos]))
    pe = scale_factor * pe
    return pe.astype(dtype)                                                  # [max_len, d_model]


# ------------------------------- kernels -----------------------------------

def _pe_add_kernel_3d(x_ref, pe_ref, o_ref):
    # x/o : (ts, B, D) dense (B sublane-aligned, D lane-aligned); pe : (ts, D)
    o_ref[...] = x_ref[...] + pe_ref[...][:, None, :]


def _pe_add_kernel_flat_aligned(x_ref, pe_ref, o_ref, *, batch, d_model):
    # x/o : (ts, B*D) lane-dense with D % 128 == 0; pe : (ts, D)
    pe = pe_ref[...]
    for b in range(batch):                 # static unroll; 128-aligned static lane slices
        sl = slice(b * d_model, (b + 1) * d_model)
        o_ref[:, sl] = x_ref[:, sl] + pe


def _pe_add_kernel_flat_full(x_ref, pe_ref, o_ref):
    # x/o/pe : (ts, B*D); PE was pre-tiled across batch in the wrapper.
    o_ref[...] = x_ref[...] + pe_ref[...]


# ----------------------------- tiling helpers -------------------------------

def _tpu_defaults():
    """(target_block_bytes, vmem_limit_bytes, num_tensorcores) per TPU generation."""
    try:
        kind = jax.devices()[0].device_kind.lower()
    except Exception:
        kind = ""
    if "v7" in kind or "7x" in kind:
        # v7x: 64 MiB VMEM per TensorCore, 2 TCs/chip, 3.2 TB/s HBM.
        return 4 * 1024 * 1024, 48 * 1024 * 1024, 2
    # v5e / v6e: 128 MiB VMEM, single TensorCore.
    return 8 * 1024 * 1024, 64 * 1024 * 1024, 1


def _choose_tile_s(S, real_row_bytes, live_row_bytes, itemsize,
                   target_block_bytes, vmem_limit_bytes, num_cores):
    """Largest sequence tile that (a) moves >= target REAL bytes per step and
    (b) keeps the double-buffered VMEM live set under ~75% of the limit.
    Tile is a multiple of the native sublane tile or the full sequence length."""
    min_s = 8 * max(1, 4 // itemsize)
    rows_target = max(1, target_block_bytes // max(1, real_row_bytes))
    rows_vmem = max(1, int(0.75 * vmem_limit_bytes) // max(1, live_row_bytes))
    rows = min(rows_target, rows_vmem)
    if rows >= S:
        ts = S
    else:
        ts = max(min_s, (rows // min_s) * min_s)
    # Megacore (v7x): keep grid >= 2 so both TensorCores get a share of the
    # "parallel" sequence axis.
    if num_cores > 1 and ts >= S:
        half = _round_up(pl.cdiv(S, 2), min_s)
        if half < S:
            ts = half
    return min(ts, S)


# ------------------------------- forward -----------------------------------

def fixed_positional_encoding_forward(x, pe, *,
                                      target_block_bytes=None,
                                      vmem_limit_bytes=None,
                                      donate_x=False,
                                      unroll_batch_limit=16):
    """x: [S, B, D], pe: [max_len, D] -> [S, B, D]   (eval-mode forward)."""
    S, B, D = x.shape
    if S > pe.shape[0]:
        raise ValueError(f"sequence length {S} exceeds PE max_len {pe.shape[0]}")
    if pe.shape[1] != D:
        raise ValueError(f"embed dim mismatch: x has {D}, pe has {pe.shape[1]}")

    auto_target, auto_vmem, num_cores = _tpu_defaults()
    if target_block_bytes is None:
        target_block_bytes = auto_target
    if vmem_limit_bytes is None:
        vmem_limit_bytes = auto_vmem

    # Slice like self.pe[:x.size(0)] and cast once (not per-element in-kernel).
    # Note: for non-f32 x this rounds PE to x.dtype before the add (torch adds
    # against an f32 buffer); numerically benign, exact for f32 inputs.
    pe_slice = pe[:S, :].astype(x.dtype)

    itemsize = jnp.dtype(x.dtype).itemsize
    lane = 128
    sub = 8 * max(1, 4 // itemsize)

    lane_aligned_d = (D % lane == 0)
    sub_aligned_b = (B % sub == 0)
    real_row_bytes = B * D * itemsize

    if lane_aligned_d and (sub_aligned_b or B > unroll_batch_limit):
        mode = "3d"                                   # dense sublanes + dense lanes
        padded_x_row = _round_up(B, sub) * D * itemsize
        pe_row_bytes = D * itemsize
    elif lane_aligned_d:
        mode = "flat_aligned"                         # lane-dense, unrolled batch adds
        padded_x_row = B * D * itemsize
        pe_row_bytes = D * itemsize
    else:
        mode = "flat_full"                            # lane-dense, wrapper-tiled PE
        padded_x_row = _round_up(B * D, lane) * itemsize
        pe_row_bytes = padded_x_row

    # Double-buffered live set per sequence row: x block + out block + pe block.
    live_row_bytes = 2 * (2 * padded_x_row + pe_row_bytes)
    ts = _choose_tile_s(S, real_row_bytes, live_row_bytes, itemsize,
                        target_block_bytes, vmem_limit_bytes, num_cores)
    grid = (pl.cdiv(S, ts),)

    if mode == "3d":
        kernel = _pe_add_kernel_3d
        x_in = x
        pe_in = pe_slice
        in_specs = [pl.BlockSpec((ts, B, D), lambda i: (i, 0, 0)),
                    pl.BlockSpec((ts, D), lambda i: (i, 0))]
        out_specs = pl.BlockSpec((ts, B, D), lambda i: (i, 0, 0))
        out_shape = jax.ShapeDtypeStruct((S, B, D), x.dtype)
    elif mode == "flat_aligned":
        kernel = functools.partial(_pe_add_kernel_flat_aligned, batch=B, d_model=D)
        x_in = x.reshape(S, B * D)                    # contiguous, free reshape
        pe_in = pe_slice
        in_specs = [pl.BlockSpec((ts, B * D), lambda i: (i, 0)),
                    pl.BlockSpec((ts, D), lambda i: (i, 0))]
        out_specs = pl.BlockSpec((ts, B * D), lambda i: (i, 0))
        out_shape = jax.ShapeDtypeStruct((S, B * D), x.dtype)
    else:  # flat_full
        kernel = _pe_add_kernel_flat_full
        x_in = x.reshape(S, B * D)
        pe_in = jnp.tile(pe_slice, (1, B))            # [S, B*D]; column b*D+d = pe[s, d]
        in_specs = [pl.BlockSpec((ts, B * D), lambda i: (i, 0)),
                    pl.BlockSpec((ts, B * D), lambda i: (i, 0))]
        out_specs = pl.BlockSpec((ts, B * D), lambda i: (i, 0))
        out_shape = jax.ShapeDtypeStruct((S, B * D), x.dtype)

    out = pl.pallas_call(
        kernel,
        out_shape=out_shape,
        grid_spec=pltpu.PrefetchScalarGridSpec(
            num_scalar_prefetch=0,
            grid=grid,
            in_specs=in_specs,
            out_specs=out_specs,
        ),
        compiler_params=pltpu.CompilerParams(
            dimension_semantics=("parallel",),
            vmem_limit_bytes=int(vmem_limit_bytes)),
        input_output_aliases={0: 0} if donate_x else {},
    )(x_in, pe_in)

    return out if mode == "3d" else out.reshape(S, B, D)


# --------------------------------- demo -------------------------------------

if __name__ == "__main__":
    key = jax.random.PRNGKey(0)
    k1, k2, k3, k4 = jax.random.split(key, 4)

    # Case 1: small unaligned embed dim (D % 128 != 0) -> flat path with
    # wrapper-tiled PE; small block target forces a multi-step grid.
    S1, B1, D1 = 64, 2, 32
    pe1 = make_fixed_positional_encoding(d_model=D1, max_len=128)
    x1 = jax.random.normal(k1, (S1, B1, D1), dtype=jnp.float32)
    out1 = jax.block_until_ready(
        fixed_positional_encoding_forward(x1, pe1, target_block_bytes=4 * 1024))
    ref1 = x1 + pe1[:S1][:, None, :]
    assert out1.shape == (S1, B1, D1)
    assert jnp.allclose(out1, ref1, atol=1e-6), "mismatch (flat_full path)"

    # Case 2: D multiple of 128, small B -> flat path with unrolled aligned adds;
    # cdiv grid with a partial trailing block (40 rows, 16-row tiles).
    S2, B2, D2 = 40, 2, 128
    pe2 = make_fixed_positional_encoding(d_model=D2, max_len=64)
    x2 = jax.random.normal(k2, (S2, B2, D2), dtype=jnp.float32)
    out2 = jax.block_until_ready(
        fixed_positional_encoding_forward(x2, pe2, target_block_bytes=16 * 1024))
    ref2 = x2 + pe2[:S2][:, None, :]
    assert out2.shape == (S2, B2, D2)
    assert jnp.allclose(out2, ref2, atol=1e-6), "mismatch (flat_aligned path)"

    # Case 3: bf16, B a sublane multiple and D lane-aligned -> dense 3-D path.
    S3, B3, D3 = 48, 16, 128
    pe3 = make_fixed_positional_encoding(d_model=D3, max_len=64, dtype=jnp.bfloat16)
    x3 = jax.random.normal(k3, (S3, B3, D3), dtype=jnp.bfloat16)
    out3 = jax.block_until_ready(
        fixed_positional_encoding_forward(x3, pe3, target_block_bytes=32 * 1024))
    ref3 = x3 + pe3[:S3].astype(jnp.bfloat16)[:, None, :]
    assert out3.shape == (S3, B3, D3)
    assert jnp.allclose(out3.astype(jnp.float32), ref3.astype(jnp.float32),
                        atol=1e-2), "mismatch (3-D path)"

    # Case 4: default (auto) tiling; B=1, unaligned D. On v7x the megacore clamp
    # splits the sequence so the grid has >= 2 steps; elsewhere it runs as one block.
    S4, B4, D4 = 16, 1, 64
    pe4 = make_fixed_positional_encoding(d_model=D4, max_len=32)
    x4 = jax.random.normal(k4, (S4, B4, D4), dtype=jnp.float32)
    out4 = jax.block_until_ready(fixed_positional_encoding_forward(x4, pe4))
    ref4 = x4 + pe4[:S4][:, None, :]
    assert out4.shape == (S4, B4, D4)
    assert jnp.allclose(out4, ref4, atol=1e-6), "mismatch (default tiling)"

    print("KERNEL_OK")
</pallas_src>

<mosaic_0001>
module attributes {stable_mosaic.version = 11 : i64} {
  func.func @_pe_add_kernel_flat_full(%arg0: i32, %arg1: memref<16x64xf32, #tpu.memory_space<vmem>>, %arg2: memref<16x64xf32, #tpu.memory_space<vmem>>, %arg3: memref<16x64xf32, #tpu.memory_space<vmem>>) attributes {dimension_semantics = [#tpu.dimension_semantics<parallel>], iteration_bounds = array<i64: 4>, scalar_prefetch = 0 : i64, scratch_operands = 0 : i64, tpu.core_type = #tpu.core_type<tc>, window_params = [{transform_indices = @transform_0, window_bounds = array<i64: 16, 64>}, {transform_indices = @transform_1, window_bounds = array<i64: 16, 64>}, {transform_indices = @transform_2, window_bounds = array<i64: 16, 64>}]} {
    %c0 = arith.constant 0 : index
    %c0_0 = arith.constant 0 : index
    %0 = vector.load %arg1[%c0, %c0_0] : memref<16x64xf32, #tpu.memory_space<vmem>>, vector<16x64xf32>
    %c0_1 = arith.constant 0 : index
    %c0_2 = arith.constant 0 : index
    %1 = vector.load %arg2[%c0_1, %c0_2] : memref<16x64xf32, #tpu.memory_space<vmem>>, vector<16x64xf32>
    %2 = arith.addf %0, %1 : vector<16x64xf32>
    %c0_3 = arith.constant 0 : index
    %c0_4 = arith.constant 0 : index
    %3 = vector.load %arg3[%c0_3, %c0_4] : memref<16x64xf32, #tpu.memory_space<vmem>>, vector<16x64xf32>
    tpu.vector_store %arg3[%c0_3, %c0_4], %2 {strides = array<i32>} : memref<16x64xf32, #tpu.memory_space<vmem>>, vector<16x64xf32>,
    return
  }
  func.func @transform_0(%arg0: i32) -> (i32, i32) {
    %c0_i32 = arith.constant 0 : i32
    %c0_i32_0 = arith.constant 0 : i32
    return %arg0, %c0_i32 : i32, i32
  }
  func.func @transform_1(%arg0: i32) -> (i32, i32) {
    %c0_i32 = arith.constant 0 : i32
    %c0_i32_0 = arith.constant 0 : i32
    return %arg0, %c0_i32 : i32, i32
  }
  func.func @transform_2(%arg0: i32) -> (i32, i32) {
    %c0_i32 = arith.constant 0 : i32
    %c0_i32_0 = arith.constant 0 : i32
    return %arg0, %c0_i32 : i32, i32
  }
}

</mosaic_0001>

<bundles_post_ra>
// kernel: tpu_custom_call.1
= control target key start
LH: loop header
LB: loop body
LE: loop exit
PB: predicated region body
PF: predicated region fallthrough
CT: control target
= control target key end

     0   :  { %7 = vsyncpa [#allocation3], 0  ;;  %s764_s0 = inlined_call_operand.hbm [shape: f32[64,64], index: 0, kind: input, shape index: {}]   ;;  %s765_s1 = inlined_call_operand.hbm [shape: f32[64,64], index: 1, kind: input, shape index: {}]   ;;  %s766_s2 = inlined_call_operand.hbm [shape: f32[64,64], index: 2, kind: output, shape index: {}]  }
   0x1   :  { %9 = vsyncpa [#allocation3 + $0x1], 0 }
   0x2   :  { %10 = vsyncpa [#allocation6], 0 }
   0x3   :  { %12 = vsyncpa [#allocation6 + $0x1], 0 }
   0x4   :  { %13 = vsyncpa [#allocation4], 0 }
   0x5   :  { %15 = vsyncpa [#allocation4 + $0x1], 0  ;;  %s548_s9 = smov 0   ;;  %s550_s10 = smov 0  }
   0x6   :  { %s552_s11 = smov 0   ;;  %s554_s12 = smov 0  }
   0x7 LB: > { %s569_s13 = sadd.s32 4294967295, %s524_s12   ;;  %s324_s14 = sadd.s32 4294967294, %s524_s12   ;;  %s524_s12 = sphi %s554_s12, %s781_s12   ;;  %s520_s11 = sphi %s552_s11, %s780_s11   ;;  %s516_s10 = sphi %s550_s10, %s779_s10   ;;  %s512_s9 = sphi %s548_s9, %s778_s9  }
   0x8   : > { %s573_s15 = sadd.s32 1, %s524_s12   ;;  %s28_s16 = sadd.s32 1, %s520_s11 }
   0x9   : > { %s25_s17 = ssub.s32 %s524_s12, %s573_s15  ;;  %p35_p0 = scmp.ne.s32.totalorder %s520_s11, %s516_s10 }
   0xa   : > { %p26_p1 = scmp.eq.s32.totalorder %s25_s17, 0  ;;  %p36_p2 = scmp.eq.s32.totalorder %s524_s12, 0 }
   0xb   : > { %p41_p3 = scmp.ne.s32.totalorder %s516_s10, %s512_s9  ;;  %p42_p4 = scmp.eq.s32.totalorder %s569_s13, 0 }
   0xc   : > { %s585_s18 = scalar_select %p26_p1, %s520_s11, %s28_s16  }
   0xd   : > { %p587_p5 = por %p36_p2, %p35_p0  ;;  %p591_p6 = por %p42_p4, %p41_p3 }
   0xe   : > { %p91_p7 = scmp.eq.s32.totalorder %s569_s13, 3  ;;  %p97_p8 = scmp.eq.s32.totalorder %s324_s14, 3 }
   0xf   : > { %s770_s20 = scalar_select %p591_p6, 1, 0 }
  0x10   : > { %p362_p9 = scmp.lt.s32.totalorder %s524_s12, 4  ;;  %p597_p10 = por %p91_p7, %p35_p0 }
  0x11   : > { %p601_p11 = por %p97_p8, %p41_p3  ;;  %s606_s23 = sand.u32 1, %s520_s11  }
  0x12   : > { %s771_s21 = scalar_select %p597_p10, 1, 0 }
  0x13   : > { %s772_s22 = scalar_select %p601_p11, 1, 0 }
  0x14   : > { %s342_s24 = sshll.u32 %s524_s12, 8  ;;  %s327_s25 = sshll.u32 %s606_s23, 4 }
  0x15   : > { %s615_s28 = scalar_lea.hbm %s764_s0, %s342_s24  ;;  %s121_s29 = scalar_lea.vmem [#allocation2], %s327_s25 }
  0x16   : > { %s128_s30 = sshll.u32 %s121_s29, 4  ;;  %p621_p12 = pnand %p362_p9, %p587_p5  ;;  %s625_s30 = int_to_ptr.vmem [resolvable:$true] %s128_s30 }
  0x17   : > { %s118_s4 = scalar_lea.sflag [#allocation3], %s606_s23  ;;  %s400_s5 = scalar_lea.hbm %s615_s28, 256 }
  0x18   : > { %p401_p13 = scmp.ne.s32.totalorder %s615_s28, %s400_s5  ;;  %p402_p0 = pneg %p621_p12 }
  0x19   : > { %s405_s8 = scalar_lea.hbm %s764_s0, 1024  ;;  %p406_p3 = scmp.lt.s32.totalorder %s615_s28, %s764_s0 }
  0x1a   : > { %p403_p1 = pnand %p402_p0, %p401_p13  ;;  %p407_p4 = scmp.lt.s32.totalorder %s405_s8, %s400_s5 }
  0x1c   : > { %p404_p2 = pneg %p403_p1  ;;  %p408_p5 = por %p407_p4, %p406_p3 }
  0x1e   : > { %p409_p7 = pnand %p408_p5, %p404_p2 }
  0x20   : > { %412 = shalt.err (!%p409_p7)
}
  0x21   : > { %s413_s17 = scalar_lea.vmem %s625_s30, 256  ;;  %s526_s19 = smov [#allocation2]  }
  0x22   : > { %p414_p8 = scmp.ne.s32.totalorder %s625_s30, %s413_s17  ;;  %s418_s26 = sshll.u32 %s526_s19, 4  ;;  %s419_s26 = int_to_ptr.vmem [resolvable:$false] %s418_s26 }
  0x23   : > { %s420_s27 = scalar_lea.vmem %s419_s26, 512  ;;  %p421_p1 = scmp.lt.s32.totalorder %s625_s30, %s419_s26 }
  0x24   : > { %p416_p9 = pnand %p414_p8, %p402_p0  ;;  %p422_p11 = scmp.lt.s32.totalorder %s420_s27, %s413_s17 }
  0x26   : > { %p417_p13 = pneg %p416_p9  ;;  %p423_p10 = por %p422_p11, %p421_p1 }
  0x28   : > { %p424_p3 = pnand %p423_p10, %p417_p13 }
  0x2a   : > { %427 = shalt.err (!%p424_p3)
}
  0x2b   : > { %s527_s29 = smov 128   ;;  %s528_s5 = smov 8  }
  0x2c   : > { %354 = dma.hbm_to_vmem [thread:$0]  (!%p621_p12), %s615_s28, 256, %s625_s30, %s118_s4, %s527_s29, %s527_s29, %s528_s5  }
  0x2d   : > { %p333_p10 = scmp.ge.s32.totalorder %s524_s12, 1  ;;  %p157_p11 = scmp.lt.s32.totalorder %s524_s12, 5 }
  0x2e   : > { %s668_s14 = scalar_lea.hbm %s765_s1, %s342_s24  ;;  %s142_s16 = scalar_lea.vmem [#allocation5], %s327_s25 }
  0x2f   : > { %p659_p2 = pnand %p333_p10, %p157_p11  ;;  %s149_s17 = sshll.u32 %s142_s16, 4  ;;  %s672_s17 = int_to_ptr.vmem [resolvable:$true] %s149_s17 }
  0x30   : > { %s139_s28 = scalar_lea.sflag [#allocation6], %s606_s23  ;;  %s428_s30 = scalar_lea.hbm %s668_s14, 256 }
  0x31   : > { %p429_p4 = scmp.ne.s32.totalorder %s668_s14, %s428_s30  ;;  %s433_s24 = scalar_lea.hbm %s765_s1, 1024 }
  0x32   : > { %p434_p8 = scmp.lt.s32.totalorder %s668_s14, %s765_s1  ;;  %p435_p9 = scmp.lt.s32.totalorder %s433_s24, %s428_s30 }
  0x33   : > { %p431_p5 = pnand %p429_p4, %p402_p0 }
  0x34   : > { %p436_p13 = por %p435_p9, %p434_p8 }
  0x35   : > { %p432_p7 = pneg %p431_p5 }
  0x37   : > { %p437_p1 = pnand %p436_p13, %p432_p7 }
  0x39   : > { %440 = shalt.err (!%p437_p1)
}
  0x3a   : > { %s441_s23 = scalar_lea.vmem %s672_s17, 256  ;;  %s529_s25 = smov [#allocation5]  }
  0x3b   : > { %p442_p3 = scmp.ne.s32.totalorder %s672_s17, %s441_s23  ;;  %s446_s7 = sshll.u32 %s529_s25, 4  ;;  %s447_s7 = int_to_ptr.vmem [resolvable:$false] %s446_s7 }
  0x3c   : > { %s448_s8 = scalar_lea.vmem %s447_s7, 512  ;;  %p449_p4 = scmp.lt.s32.totalorder %s672_s17, %s447_s7 }
  0x3d   : > { %p444_p10 = pnand %p442_p3, %p402_p0  ;;  %p450_p5 = scmp.lt.s32.totalorder %s448_s8, %s441_s23 }
  0x3f   : > { %p445_p11 = pneg %p444_p10  ;;  %p451_p6 = por %p450_p5, %p449_p4 }
  0x41   : > { %p452_p8 = pnand %p451_p6, %p445_p11 }
  0x43   : > { %455 = shalt.err (!%p452_p8)
}
  0x44   : > { %357 = dma.hbm_to_vmem [thread:$0]  (!%p621_p12), %s668_s14, 256, %s672_s17, %s139_s28, %s527_s29, %s527_s29, %s528_s5  }
  0x45   : > { %161 = sbr.rel (%p659_p2) target bundleno = 103 (0x67), region = 28  ;;  %s703_s16 = sand.u32 (!%p659_p2), 1, %s516_s10  }
  0x46   : > { %s334_s30 = sshll.u32 (!%p659_p2), %s703_s16, 4  ;;  %s164_s4 = scalar_lea.sflag (!%p659_p2), [#allocation3], %s703_s16 }
  0x47   : > { %s167_s19 = scalar_lea.vmem (!%p659_p2), [#allocation2], %s334_s30  ;;  %p775_p6 = scmp.ne.s32.totalorder (!%p659_p2), %s770_s20, 0 }
  0x4a   : > { %499 = dma.done.wait (%p775_p6), %s164_s4, 256  }
  0x4b   : > { %501 = vsyncadd (%p775_p6), %s164_s4, 4294967040  ;;  %s173_s3 = scalar_lea.sflag [#allocation6], %s703_s16  ;;  %s176_s29 = scalar_lea.vmem [#allocation5], %s334_s30 }
  0x4c   : > { %503 = dma.done.wait (%p775_p6), %s173_s3, 256  }
  0x4d   : > { %505 = vsyncadd (%p775_p6), %s173_s3, 4294967040  ;;  %s201_s5 = scalar_lea.vmem [#allocation7], %s334_s30  ;;  %s344_s14 = sshll.u32 %s569_s13, 8  ;;  %v205_v0 = vld [vmem:[%s167_s19] sm:$0xff]  ;;  %vm211_vm0 = vcmask 523264   ;;  %v206_v2 = vld [vmem:[%s167_s19 + $0x8] sm:$0xff] }
  0x4e   : > { %s228_s6 = sshll.u32 %s201_s5, 4  ;;  %v207_v1 = vld [vmem:[%s176_s29] sm:$0xff]  ;;  %v208_v4 = vld [vmem:[%s176_s29 + $0x8] sm:$0xff]  ;;  %s722_s28 = scalar_lea.hbm %s766_s2, %s344_s14  ;;  %s717_s6 = int_to_ptr.vmem [resolvable:$true] %s228_s6 }
  0x4f   : > { %v209_v3 = vadd.f32 %v207_v1, %v205_v0  ;;  %v210_v5 = vadd.f32 %v208_v4, %v206_v2  ;;  %s215_s13 = scalar_lea.sflag [#allocation4], %s703_s16  ;;  %s456_s24 = scalar_lea.vmem %s717_s6, 256 }
  0x50   : > { %p457_p12 = scmp.ne.s32.totalorder %s717_s6, %s456_s24  ;;  %p776_p0 = scmp.ne.s32.totalorder %s771_s21, 0 }
  0x51   : > { %212 = vst.msk [vmem:[%s201_s5] sm:$0xff] %vm211_vm0, %v209_v3  ;;  %213 = vst.msk [vmem:[%s201_s5 + $0x8] sm:$0xff] %vm211_vm0, %v210_v5  ;;  %s530_s26 = smov [#allocation7]  }
  0x52   : > { %p458_p2 = pnand %p457_p12, %p776_p0  ;;  %s460_s27 = sshll.u32 %s530_s26, 4  ;;  %s461_s27 = int_to_ptr.vmem [resolvable:$false] %s460_s27 }
  0x53   : > { %s462_s23 = scalar_lea.vmem %s461_s27, 512  ;;  %p463_p9 = scmp.lt.s32.totalorder %s717_s6, %s461_s27 }
  0x54   : > { %p459_p7 = pneg %p458_p2  ;;  %p464_p13 = scmp.lt.s32.totalorder %s462_s23, %s456_s24 }
  0x56   : > { %p465_p1 = por %p464_p13, %p463_p9 }
  0x58   : > { %p466_p3 = pnand %p465_p1, %p459_p7 }
  0x5a   : > { %469 = shalt.err (!%p466_p3)
}
  0x5b   : > { %s470_s25 = scalar_lea.hbm %s722_s28, 256  ;;  %s474_s30 = scalar_lea.hbm %s766_s2, 1024 }
  0x5c   : > { %p471_p10 = scmp.ne.s32.totalorder %s722_s28, %s470_s25  ;;  %p475_p5 = scmp.lt.s32.totalorder %s722_s28, %s766_s2 }
  0x5d   : > { %p476_p8 = scmp.lt.s32.totalorder %s474_s30, %s470_s25 }
  0x5e   : > { %p472_p11 = pnand %p471_p10, %p776_p0 }
  0x5f   : > { %p477_p6 = por %p476_p8, %p475_p5 }
  0x60   : > { %p473_p4 = pneg %p472_p11 }
  0x62   : > { %p478_p12 = pnand %p477_p6, %p473_p4 }
  0x64   : > { %481 = shalt.err (!%p478_p12)
}
  0x65   : > { %s531_s3 = smov 128   ;;  %s532_s29 = smov 8  }
  0x66   : > { %349 = dma.vmem_to_hbm [thread:$0]  (%p776_p0), %s717_s6, 256, %s722_s28, %s215_s13, %s531_s3, %s531_s3, %s532_s29  }
  0x67 PF: > { %p363_p2 = scmp.ge.s32.totalorder %s524_s12, 2  ;;  %s243_s5 = sand.u32 1, %s512_s9  }
  0x68   : > { %p777_p7 = scmp.ne.s32.totalorder %s772_s22, 0  ;;  %s244_s14 = scalar_lea.sflag [#allocation4], %s243_s5 }
  0x6a   : > { %p359_p9 = pnand %p363_p2, %p777_p7 }
  0x6c   : > { %p360_p13 = pneg %p359_p9 }
  0x6e   : > { %507 = dma.done.wait (%p360_p13), %s244_s14, 256  }
  0x6f   : > { %509 = vsyncadd (%p360_p13), %s244_s14, 4294967040  ;;  %p18_p1 = scmp.ge.s32.totalorder %s573_s15, 6   ;;  %s778_s9 = smov %s516_s10 }
  0x70   : > { %s779_s10 = smov %s520_s11  ;;  %s780_s11 = smov %s585_s18 }
  0x71   : > { %s781_s12 = smov %s573_s15  ;;  %20 = sbr.rel (!%p18_p1) target bundleno = 7 (0x7), region = 86 }
  0x76   :  { %249 = vsyncpa [#allocation3], 1 }
  0x77   :  { %251 = vsyncpa [#allocation3 + $0x1], 1 }
  0x78   :  { %252 = vsyncpa [#allocation6], 1 }
  0x79   :  { %254 = vsyncpa [#allocation6 + $0x1], 1 }
  0x7a   :  { %255 = vsyncpa [#allocation4], 1 }
  0x7b   :  { %257 = vsyncpa [#allocation4 + $0x1], 1 }

</bundles_post_ra>
